<compile_context>
chip_gen: v5e
topology: v5e:2x2
jax: 0.10.0
libtpu: 0.0.40
codegen_flags: <defaults>
</compile_context>

<pallas_src>
import functools

import jax
import jax.numpy as jnp
import numpy as np
from jax import lax
from jax.experimental import pallas as pl
from jax.experimental.pallas import tpu as pltpu

RR_TIME = 3          # RRconv_time
BN_EPS = 1e-5
SRC_CHUNK = 128      # source (pre-upsample) columns per expansion chunk (one lane tile)
MAX_KL = 4           # max 640-wide chunks handled per grid step along L
MAX_UNROLL = 8       # cap on b_tile * kl (static in-kernel unroll)


def _largest_divisor(n, cap):
    for d in range(min(cap, n), 0, -1):
        if n % d == 0:
            return d
    return 1


def _make_expand_matrix(upsize):
    """E[s, m] = 1 iff output position m of a chunk (m >= 1) reads source column s."""
    chunk = SRC_CHUNK * upsize
    m = np.arange(chunk)
    src = (m - 1) // upsize
    e = (m >= 1)[None, :] & (src[None, :] == np.arange(SRC_CHUNK)[:, None])
    return jnp.asarray(e, dtype=jnp.float32)


def upconv_concat_rrblock(target_layer, concat_layer, folded_params, upsize=5):
    """target_layer: (N, Cin, Lt), concat_layer: (N, Cout, Lc) -> (N, Cout, Lc)."""
    N, Cin, Lt = target_layer.shape
    Nc, Cout, Lc = concat_layer.shape
    assert N == Nc
    assert Lc <= upsize * Lt + 2, "slice longer than the upsampled+padded branch"

    chunk = SRC_CHUNK * upsize                 # output positions per chunk (lane-dense)
    n_chunks = pl.cdiv(Lc, chunk)
    kl = _largest_divisor(n_chunks, MAX_KL)    # chunks per grid step along L
    b_tile = _largest_divisor(N, max(1, MAX_UNROLL // kl))
    if (N // b_tile) * (n_chunks // kl) < 2:   # keep >= 2 grid steps (2 TCs on v7x)
        b_tile = 1
    lt_tile = kl * chunk                       # output lanes per grid step
    s_blk = kl * SRC_CHUNK                     # source lanes per grid step
    lcp = n_chunks * chunk                     # padded output length
    ltp = n_chunks * SRC_CHUNK                 # padded source length (= lcp // upsize)

    # Pad/trim the PRE-upsample target and pad the concat branch.  Zero source
    # columns reproduce the padding=1 boundary value relu(folded_bias) exactly;
    # zero concat columns only influence positions that are sliced off.
    tgt = target_layer[:, :, :min(Lt, ltp)]
    if tgt.shape[2] < ltp:
        tgt = jnp.pad(tgt, ((0, 0), (0, 0), (0, ltp - tgt.shape[2])))
    xc = concat_layer
    if Lc < lcp:
        xc = jnp.pad(xc, ((0, 0), (0, 0), (0, lcp - Lc)))

    E = _make_expand_matrix(upsize)            # (128, chunk) f32 constant
    grid = (N // b_tile, lcp // lt_tile)
    f32 = jnp.float32

    def kernel(tgt_ref, tgtp_ref, xc_ref, e_ref,
               wu_ref, bu_ref, ws1_ref, ws2_ref, bs_ref,
               wi_ref, bi_ref, w11_ref, b11_ref, wr_ref, br_ref, out_ref):
        j = pl.program_id(1)
        relu = lambda v: jnp.maximum(v, 0.0)
        dot = functools.partial(jnp.dot, preferred_element_type=f32)

        e = e_ref[...]
        wu, bu = wu_ref[...], bu_ref[...]
        ws1, ws2, bs = ws1_ref[...], ws2_ref[...], bs_ref[...]
        wi, bi = wi_ref[...], bi_ref[...]
        w11, b11 = w11_ref[...], b11_ref[...]
        wr, br = wr_ref[...], br_ref[...]

        const_col = relu(bu)                   # conv(0)+BN+ReLU value at the pad position
        lane0 = lax.broadcasted_iota(jnp.int32, (1, chunk), 1) == 0

        for b in range(b_tile):
            tgt_b = tgt_ref[b].astype(f32)     # (Cin, s_blk)   pre-upsample source
            xc_b = xc_ref[b].astype(f32)       # (Cout, lt_tile)
            # Value feeding output column 0 of this L-block: conv of the LAST source
            # column of the previous block (or the padding constant when j == 0).
            prev_blk = tgtp_ref[b].astype(f32)
            yu_prev = relu(dot(wu, prev_blk[:, s_blk - SRC_CHUNK:s_blk]) + bu)
            carry_col = jnp.where(j == 0, const_col,
                                  yu_prev[:, SRC_CHUNK - 1:SRC_CHUNK])

            for k in range(kl):
                t_chunk = tgt_b[:, k * SRC_CHUNK:(k + 1) * SRC_CHUNK]
                # upsample-branch conv_block at source resolution (BN folded,
                # dropout = identity); k=1 conv commutes with the NN upsample.
                yu = relu(dot(wu, t_chunk) + bu)              # (Cout, 128)
                # nearest-neighbour expand x upsize on the MXU; column 0 = carry
                u = jnp.where(lane0, carry_col, dot(yu, e))   # (Cout, chunk)

                xck = xc_b[:, k * chunk:(k + 1) * chunk]
                # conv_skip_conncet on concat([u, xc], C) == Ws1 @ u + Ws2 @ xc + bs
                cat = dot(ws1, u) + dot(ws2, xck) + bs
                # RRconv_block.conv_block_init
                c = relu(dot(wi, cat) + bi)
                # RRconv_block.conv_1x1 (computed from c BEFORE the in-place doubling)
                c11 = dot(w11, c) + b11
                # PyTorch: `res_unit = conv_out; res_unit += conv_out` aliases
                # conv_out, doubling it in place -> every later add uses 2*c.
                c2 = c + c
                r = c2
                for i in range(RR_TIME):
                    if i > 0:
                        r = r + c2
                    r = relu(dot(wr, r) + br)

                # lane-dense (multiple-of-128) unmasked store
                out_ref[b, :, k * chunk:(k + 1) * chunk] = (r + c11).astype(out_ref.dtype)
                carry_col = yu[:, SRC_CHUNK - 1:SRC_CHUNK]

    tgt_cur_spec = pl.BlockSpec((b_tile, Cin, s_blk), lambda n, j: (n, 0, j))
    tgt_prev_spec = pl.BlockSpec((b_tile, Cin, s_blk),
                                 lambda n, j: (n, 0, jnp.maximum(j - 1, 0)))
    xc_spec = pl.BlockSpec((b_tile, Cout, lt_tile), lambda n, j: (n, 0, j))
    const2d = lambda a: pl.BlockSpec(a.shape, lambda n, j: (0, 0))

    out = pl.pallas_call(
        kernel,
        out_shape=jax.ShapeDtypeStruct((N, Cout, lcp), jnp.float32),
        grid=grid,
        in_specs=[tgt_cur_spec, tgt_prev_spec, xc_spec, const2d(E)]
                 + [const2d(p) for p in folded_params],
        out_specs=pl.BlockSpec((b_tile, Cout, lt_tile), lambda n, j: (n, 0, j)),
        compiler_params=pltpu.CompilerParams(
            dimension_semantics=("parallel", "parallel"),
            vmem_limit_bytes=32 * 1024 * 1024),   # safely under v7x's 64 MiB physical
    )(tgt, tgt, xc, E, *folded_params)

    return out[:, :, :Lc]                         # already NCL -- no transposes


# ---------------- parameter construction (deterministic, synthetic) ----------------

def init_raw_params(key, Cin, Cout):
    ks = jax.random.split(key, 16)
    W = lambda k, co, ci: jax.random.normal(k, (co, ci), jnp.float32) / np.sqrt(ci)
    B = lambda k, co: 0.1 * jax.random.normal(k, (co,), jnp.float32)
    G = lambda k, co: 1.0 + 0.1 * jax.random.normal(k, (co,), jnp.float32)
    p = {}
    p["cb_W"], p["cb_b"] = W(ks[0], Cout, Cin), B(ks[1], Cout)          # conv_block
    p["cb_g"], p["cb_be"] = G(ks[2], Cout), B(ks[3], Cout)
    p["sc_W"], p["sc_b"] = W(ks[4], Cout, 2 * Cout), B(ks[5], Cout)      # conv_skip_conncet
    p["ri_W"], p["ri_b"] = W(ks[6], Cout, Cout), B(ks[7], Cout)          # RR conv_block_init
    p["ri_g"], p["ri_be"] = G(ks[8], Cout), B(ks[9], Cout)
    p["r11_W"], p["r11_b"] = W(ks[10], Cout, Cout), B(ks[11], Cout)      # RR conv_1x1
    p["rr_W"], p["rr_b"] = W(ks[12], Cout, Cout), B(ks[13], Cout)        # RR conv_block_res
    p["rr_g"], p["rr_be"] = G(ks[14], Cout), B(ks[15], Cout)
    return p


def fold_params(p):
    """Fold eval-mode BatchNorm (running_mean=0, running_var=1) into the conv weights.
    Weights stay (C_out, C_in) -- channels-first -- and biases become (C_out, 1)."""
    def fold(W, b, g, be):
        s = g / jnp.sqrt(1.0 + BN_EPS)
        return ((W * s[:, None]).astype(jnp.float32),
                ((b * s + be)[:, None]).astype(jnp.float32))

    Cout = p["cb_W"].shape[0]
    wu, bu = fold(p["cb_W"], p["cb_b"], p["cb_g"], p["cb_be"])
    ws1 = p["sc_W"][:, :Cout]          # acts on the upsample branch u
    ws2 = p["sc_W"][:, Cout:]          # acts on concat_layer
    bs = p["sc_b"][:, None]
    wi, bi = fold(p["ri_W"], p["ri_b"], p["ri_g"], p["ri_be"])
    w11, b11 = p["r11_W"], p["r11_b"][:, None]
    wr, br = fold(p["rr_W"], p["rr_b"], p["rr_g"], p["rr_be"])
    return (wu, bu, ws1, ws2, bs, wi, bi, w11, b11, wr, br)


# ---------------- pure-JAX reference mirroring the PyTorch forward ----------------

def reference_forward(target_layer, concat_layer, p, upsize=5):
    hp = jax.lax.Precision.HIGHEST

    def conv1x1(x, W, b):                                    # x: (N, C, L)
        return jnp.einsum('oi,nil->nol', W, x, precision=hp) + b[None, :, None]

    def cb(x, W, b, g, be):                                  # conv_block, eval mode
        y = conv1x1(x, W, b)
        s = g / jnp.sqrt(1.0 + BN_EPS)
        y = y * s[None, :, None] + be[None, :, None]
        return jnp.maximum(y, 0.0)

    Lc = concat_layer.shape[2]
    up = jnp.repeat(target_layer, upsize, axis=2)
    up = jnp.pad(up, ((0, 0), (0, 0), (1, 1)))               # conv1d padding=1
    u = cb(up, p["cb_W"], p["cb_b"], p["cb_g"], p["cb_be"])
    skip = jnp.concatenate([u[:, :, :Lc], concat_layer], axis=1)
    cat = conv1x1(skip, p["sc_W"], p["sc_b"])
    c = cb(cat, p["ri_W"], p["ri_b"], p["ri_g"], p["ri_be"])
    c11 = conv1x1(c, p["r11_W"], p["r11_b"])
    c2 = 2.0 * c                                             # in-place alias semantics
    r = c2
    for i in range(RR_TIME):
        if i > 0:
            r = r + c2
        r = cb(r, p["rr_W"], p["rr_b"], p["rr_g"], p["rr_be"])
    return r + c11


if __name__ == "__main__":
    key = jax.random.PRNGKey(0)
    cases = [
        # small single-tile case
        dict(N=2, Cin=8, Cout=8, Lt=8, Lc=40, upsize=5),
        # multi-chunk / multi-L-tile / b_tile=2 case (exercises the tile boundaries;
        # lengths are modest vs the module's own (50, 3, 6000) example input)
        dict(N=2, Cin=8, Cout=16, Lt=740, Lc=3700, upsize=5),
    ]

    for cfg in cases:
        k_t, k_c, k_p, key = jax.random.split(key, 4)
        target_layer = jax.random.normal(k_t, (cfg["N"], cfg["Cin"], cfg["Lt"]), jnp.float32)
        concat_layer = jax.random.normal(k_c, (cfg["N"], cfg["Cout"], cfg["Lc"]), jnp.float32)

        raw = init_raw_params(k_p, cfg["Cin"], cfg["Cout"])
        folded = fold_params(raw)

        # activations travel HBM->VMEM in bf16; weights & all accumulation stay f32
        tgt_bf16 = target_layer.astype(jnp.bfloat16)
        cat_bf16 = concat_layer.astype(jnp.bfloat16)

        out = upconv_concat_rrblock(tgt_bf16, cat_bf16, folded, upsize=cfg["upsize"])
        out = jax.block_until_ready(out)

        # the reference sees the same (bf16-rounded) activation values as the kernel
        ref = reference_forward(tgt_bf16.astype(jnp.float32),
                                cat_bf16.astype(jnp.float32), raw, upsize=cfg["upsize"])
        np.testing.assert_allclose(np.asarray(out), np.asarray(ref), rtol=2e-2, atol=2e-2)

    print("KERNEL_OK")
</pallas_src>

<mosaic_0001>
module attributes {stable_mosaic.version = 11 : i64} {
  func.func @kernel(%arg0: i32, %arg1: i32, %arg2: memref<1x8x128xbf16, #tpu.memory_space<vmem>>, %arg3: memref<1x8x128xbf16, #tpu.memory_space<vmem>>, %arg4: memref<1x8x640xbf16, #tpu.memory_space<vmem>>, %arg5: memref<128x640xf32, #tpu.memory_space<vmem>>, %arg6: memref<8x8xf32, #tpu.memory_space<vmem>>, %arg7: memref<8x1xf32, #tpu.memory_space<vmem>>, %arg8: memref<8x8xf32, #tpu.memory_space<vmem>>, %arg9: memref<8x8xf32, #tpu.memory_space<vmem>>, %arg10: memref<8x1xf32, #tpu.memory_space<vmem>>, %arg11: memref<8x8xf32, #tpu.memory_space<vmem>>, %arg12: memref<8x1xf32, #tpu.memory_space<vmem>>, %arg13: memref<8x8xf32, #tpu.memory_space<vmem>>, %arg14: memref<8x1xf32, #tpu.memory_space<vmem>>, %arg15: memref<8x8xf32, #tpu.memory_space<vmem>>, %arg16: memref<8x1xf32, #tpu.memory_space<vmem>>, %arg17: memref<1x8x640xf32, #tpu.memory_space<vmem>>) attributes {dimension_semantics = [#tpu.dimension_semantics<parallel>, #tpu.dimension_semantics<parallel>], iteration_bounds = array<i64: 2, 1>, scalar_prefetch = 0 : i64, scratch_operands = 0 : i64, tpu.core_type = #tpu.core_type<tc>, window_params = [{transform_indices = @transform_0, window_bounds = array<i64: 1, 8, 128>}, {transform_indices = @transform_1, window_bounds = array<i64: 1, 8, 128>}, {transform_indices = @transform_2, window_bounds = array<i64: 1, 8, 640>}, {pipeline_mode = #tpu.pipeline_mode<synchronous>, transform_indices = @transform_3, window_bounds = array<i64: 128, 640>}, {pipeline_mode = #tpu.pipeline_mode<synchronous>, transform_indices = @transform_4, window_bounds = array<i64: 8, 8>}, {pipeline_mode = #tpu.pipeline_mode<synchronous>, transform_indices = @transform_5, window_bounds = array<i64: 8, 1>}, {pipeline_mode = #tpu.pipeline_mode<synchronous>, transform_indices = @transform_6, window_bounds = array<i64: 8, 8>}, {pipeline_mode = #tpu.pipeline_mode<synchronous>, transform_indices = @transform_7, window_bounds = array<i64: 8, 8>}, {pipeline_mode = #tpu.pipeline_mode<synchronous>, transform_indices = @transform_8, window_bounds = array<i64: 8, 1>}, {pipeline_mode = #tpu.pipeline_mode<synchronous>, transform_indices = @transform_9, window_bounds = array<i64: 8, 8>}, {pipeline_mode = #tpu.pipeline_mode<synchronous>, transform_indices = @transform_10, window_bounds = array<i64: 8, 1>}, {pipeline_mode = #tpu.pipeline_mode<synchronous>, transform_indices = @transform_11, window_bounds = array<i64: 8, 8>}, {pipeline_mode = #tpu.pipeline_mode<synchronous>, transform_indices = @transform_12, window_bounds = array<i64: 8, 1>}, {pipeline_mode = #tpu.pipeline_mode<synchronous>, transform_indices = @transform_13, window_bounds = array<i64: 8, 8>}, {pipeline_mode = #tpu.pipeline_mode<synchronous>, transform_indices = @transform_14, window_bounds = array<i64: 8, 1>}, {transform_indices = @transform_15, window_bounds = array<i64: 1, 8, 640>}]} {
    %c0 = arith.constant 0 : index
    %c0_0 = arith.constant 0 : index
    %0 = vector.load %arg5[%c0, %c0_0] : memref<128x640xf32, #tpu.memory_space<vmem>>, vector<128x640xf32>
    %c0_1 = arith.constant 0 : index
    %c0_2 = arith.constant 0 : index
    %1 = vector.load %arg6[%c0_1, %c0_2] : memref<8x8xf32, #tpu.memory_space<vmem>>, vector<8x8xf32>
    %c0_3 = arith.constant 0 : index
    %c0_4 = arith.constant 0 : index
    %2 = vector.load %arg7[%c0_3, %c0_4] : memref<8x1xf32, #tpu.memory_space<vmem>>, vector<8x1xf32>
    %c0_5 = arith.constant 0 : index
    %c0_6 = arith.constant 0 : index
    %3 = vector.load %arg8[%c0_5, %c0_6] : memref<8x8xf32, #tpu.memory_space<vmem>>, vector<8x8xf32>
    %c0_7 = arith.constant 0 : index
    %c0_8 = arith.constant 0 : index
    %4 = vector.load %arg9[%c0_7, %c0_8] : memref<8x8xf32, #tpu.memory_space<vmem>>, vector<8x8xf32>
    %c0_9 = arith.constant 0 : index
    %c0_10 = arith.constant 0 : index
    %5 = vector.load %arg10[%c0_9, %c0_10] : memref<8x1xf32, #tpu.memory_space<vmem>>, vector<8x1xf32>
    %c0_11 = arith.constant 0 : index
    %c0_12 = arith.constant 0 : index
    %6 = vector.load %arg11[%c0_11, %c0_12] : memref<8x8xf32, #tpu.memory_space<vmem>>, vector<8x8xf32>
    %c0_13 = arith.constant 0 : index
    %c0_14 = arith.constant 0 : index
    %7 = vector.load %arg12[%c0_13, %c0_14] : memref<8x1xf32, #tpu.memory_space<vmem>>, vector<8x1xf32>
    %c0_15 = arith.constant 0 : index
    %c0_16 = arith.constant 0 : index
    %8 = vector.load %arg13[%c0_15, %c0_16] : memref<8x8xf32, #tpu.memory_space<vmem>>, vector<8x8xf32>
    %c0_17 = arith.constant 0 : index
    %c0_18 = arith.constant 0 : index
    %9 = vector.load %arg14[%c0_17, %c0_18] : memref<8x1xf32, #tpu.memory_space<vmem>>, vector<8x1xf32>
    %c0_19 = arith.constant 0 : index
    %c0_20 = arith.constant 0 : index
    %10 = vector.load %arg15[%c0_19, %c0_20] : memref<8x8xf32, #tpu.memory_space<vmem>>, vector<8x8xf32>
    %c0_21 = arith.constant 0 : index
    %c0_22 = arith.constant 0 : index
    %11 = vector.load %arg16[%c0_21, %c0_22] : memref<8x1xf32, #tpu.memory_space<vmem>>, vector<8x1xf32>
    %cst = arith.constant 0.000000e+00 : f32
    %12 = vector.broadcast %cst : f32 to vector<8x1xf32>
    %13 = arith.maximumf %2, %12 : vector<8x1xf32>
    %14 = tpu.iota {dimensions = array<i32: 1>} : vector<1x640xi32>
    %c0_i32 = arith.constant 0 : i32
    %15 = vector.broadcast %c0_i32 : i32 to vector<1x640xi32>
    %16 = arith.cmpi eq, %14, %15 : vector<1x640xi32>
    %c0_23 = arith.constant 0 : index
    %c0_24 = arith.constant 0 : index
    %c0_25 = arith.constant 0 : index
    %17 = vector.load %arg2[%c0_23, %c0_24, %c0_25] : memref<1x8x128xbf16, #tpu.memory_space<vmem>>, vector<1x8x128xbf16>
    %18 = vector.shape_cast %17 : vector<1x8x128xbf16> to vector<8x128xbf16>
    %19 = arith.extf %18 : vector<8x128xbf16> to vector<8x128xf32>
    %c0_26 = arith.constant 0 : index
    %c0_27 = arith.constant 0 : index
    %c0_28 = arith.constant 0 : index
    %20 = vector.load %arg4[%c0_26, %c0_27, %c0_28] : memref<1x8x640xbf16, #tpu.memory_space<vmem>>, vector<1x8x640xbf16>
    %21 = vector.shape_cast %20 : vector<1x8x640xbf16> to vector<8x640xbf16>
    %22 = arith.extf %21 : vector<8x640xbf16> to vector<8x640xf32>
    %c0_29 = arith.constant 0 : index
    %c0_30 = arith.constant 0 : index
    %c0_31 = arith.constant 0 : index
    %23 = vector.load %arg3[%c0_29, %c0_30, %c0_31] : memref<1x8x128xbf16, #tpu.memory_space<vmem>>, vector<1x8x128xbf16>
    %24 = vector.shape_cast %23 : vector<1x8x128xbf16> to vector<8x128xbf16>
    %25 = arith.extf %24 : vector<8x128xbf16> to vector<8x128xf32>
    %cst_32 = arith.constant dense<0.000000e+00> : vector<8x128xf32>
    %26 = tpu.matmul %1, %25, %cst_32 {dimension_numbers = #tpu.dot_dimension_numbers<[1], [0], [0], [1], [0, 0, 1, 1], [], []>} : vector<8x8xf32>, vector<8x128xf32>, vector<8x128xf32> -> vector<8x128xf32>
    %27 = vector.broadcast %2 : vector<8x1xf32> to vector<8x128xf32>
    %28 = arith.addf %26, %27 : vector<8x128xf32>
    %cst_33 = arith.constant 0.000000e+00 : f32
    %29 = vector.broadcast %cst_33 : f32 to vector<8x128xf32>
    %30 = arith.maximumf %28, %29 : vector<8x128xf32>
    %c0_i32_34 = arith.constant 0 : i32
    %31 = arith.cmpi eq, %arg1, %c0_i32_34 : i32
    %32 = vector.extract_strided_slice %30 {offsets = [0, 127], sizes = [8, 1], strides = [1, 1]} : vector<8x128xf32> to vector<8x1xf32>
    %33 = arith.select %31, %13, %32 : vector<8x1xf32>
    %cst_35 = arith.constant dense<0.000000e+00> : vector<8x128xf32>
    %34 = tpu.matmul %1, %19, %cst_35 {dimension_numbers = #tpu.dot_dimension_numbers<[1], [0], [0], [1], [0, 0, 1, 1], [], []>} : vector<8x8xf32>, vector<8x128xf32>, vector<8x128xf32> -> vector<8x128xf32>
    %35 = vector.broadcast %2 : vector<8x1xf32> to vector<8x128xf32>
    %36 = arith.addf %34, %35 : vector<8x128xf32>
    %cst_36 = arith.constant 0.000000e+00 : f32
    %37 = vector.broadcast %cst_36 : f32 to vector<8x128xf32>
    %38 = arith.maximumf %36, %37 : vector<8x128xf32>
    %cst_37 = arith.constant dense<0.000000e+00> : vector<8x640xf32>
    %39 = tpu.matmul %38, %0, %cst_37 {dimension_numbers = #tpu.dot_dimension_numbers<[1], [0], [0], [1], [0, 0, 1, 1], [], []>} : vector<8x128xf32>, vector<128x640xf32>, vector<8x640xf32> -> vector<8x640xf32>
    %40 = vector.shape_cast %16 : vector<1x640xi1> to vector<1x640xi1>
    %41 = vector.broadcast %40 : vector<1x640xi1> to vector<8x640xi1>
    %42 = vector.shape_cast %33 : vector<8x1xf32> to vector<8x1xf32>
    %43 = vector.broadcast %42 : vector<8x1xf32> to vector<8x640xf32>
    %44 = arith.select %41, %43, %39 : vector<8x640xi1>, vector<8x640xf32>
    %cst_38 = arith.constant dense<0.000000e+00> : vector<8x640xf32>
    %45 = tpu.matmul %3, %44, %cst_38 {dimension_numbers = #tpu.dot_dimension_numbers<[1], [0], [0], [1], [0, 0, 1, 1], [], []>} : vector<8x8xf32>, vector<8x640xf32>, vector<8x640xf32> -> vector<8x640xf32>
    %cst_39 = arith.constant dense<0.000000e+00> : vector<8x640xf32>
    %46 = tpu.matmul %4, %22, %cst_39 {dimension_numbers = #tpu.dot_dimension_numbers<[1], [0], [0], [1], [0, 0, 1, 1], [], []>} : vector<8x8xf32>, vector<8x640xf32>, vector<8x640xf32> -> vector<8x640xf32>
    %47 = arith.addf %45, %46 : vector<8x640xf32>
    %48 = vector.broadcast %5 : vector<8x1xf32> to vector<8x640xf32>
    %49 = arith.addf %47, %48 : vector<8x640xf32>
    %cst_40 = arith.constant dense<0.000000e+00> : vector<8x640xf32>
    %50 = tpu.matmul %6, %49, %cst_40 {dimension_numbers = #tpu.dot_dimension_numbers<[1], [0], [0], [1], [0, 0, 1, 1], [], []>} : vector<8x8xf32>, vector<8x640xf32>, vector<8x640xf32> -> vector<8x640xf32>
    %51 = vector.broadcast %7 : vector<8x1xf32> to vector<8x640xf32>
    %52 = arith.addf %50, %51 : vector<8x640xf32>
    %cst_41 = arith.constant 0.000000e+00 : f32
    %53 = vector.broadcast %cst_41 : f32 to vector<8x640xf32>
    %54 = arith.maximumf %52, %53 : vector<8x640xf32>
    %cst_42 = arith.constant dense<0.000000e+00> : vector<8x640xf32>
    %55 = tpu.matmul %8, %54, %cst_42 {dimension_numbers = #tpu.dot_dimension_numbers<[1], [0], [0], [1], [0, 0, 1, 1], [], []>} : vector<8x8xf32>, vector<8x640xf32>, vector<8x640xf32> -> vector<8x640xf32>
    %56 = vector.broadcast %9 : vector<8x1xf32> to vector<8x640xf32>
    %57 = arith.addf %55, %56 : vector<8x640xf32>
    %58 = arith.addf %54, %54 : vector<8x640xf32>
    %cst_43 = arith.constant dense<0.000000e+00> : vector<8x640xf32>
    %59 = tpu.matmul %10, %58, %cst_43 {dimension_numbers = #tpu.dot_dimension_numbers<[1], [0], [0], [1], [0, 0, 1, 1], [], []>} : vector<8x8xf32>, vector<8x640xf32>, vector<8x640xf32> -> vector<8x640xf32>
    %60 = vector.broadcast %11 : vector<8x1xf32> to vector<8x640xf32>
    %61 = arith.addf %59, %60 : vector<8x640xf32>
    %cst_44 = arith.constant 0.000000e+00 : f32
    %62 = vector.broadcast %cst_44 : f32 to vector<8x640xf32>
    %63 = arith.maximumf %61, %62 : vector<8x640xf32>
    %64 = arith.addf %63, %58 : vector<8x640xf32>
    %cst_45 = arith.constant dense<0.000000e+00> : vector<8x640xf32>
    %65 = tpu.matmul %10, %64, %cst_45 {dimension_numbers = #tpu.dot_dimension_numbers<[1], [0], [0], [1], [0, 0, 1, 1], [], []>} : vector<8x8xf32>, vector<8x640xf32>, vector<8x640xf32> -> vector<8x640xf32>
    %66 = vector.broadcast %11 : vector<8x1xf32> to vector<8x640xf32>
    %67 = arith.addf %65, %66 : vector<8x640xf32>
    %cst_46 = arith.constant 0.000000e+00 : f32
    %68 = vector.broadcast %cst_46 : f32 to vector<8x640xf32>
    %69 = arith.maximumf %67, %68 : vector<8x640xf32>
    %70 = arith.addf %69, %58 : vector<8x640xf32>
    %cst_47 = arith.constant dense<0.000000e+00> : vector<8x640xf32>
    %71 = tpu.matmul %10, %70, %cst_47 {dimension_numbers = #tpu.dot_dimension_numbers<[1], [0], [0], [1], [0, 0, 1, 1], [], []>} : vector<8x8xf32>, vector<8x640xf32>, vector<8x640xf32> -> vector<8x640xf32>
    %72 = vector.broadcast %11 : vector<8x1xf32> to vector<8x640xf32>
    %73 = arith.addf %71, %72 : vector<8x640xf32>
    %cst_48 = arith.constant 0.000000e+00 : f32
    %74 = vector.broadcast %cst_48 : f32 to vector<8x640xf32>
    %75 = arith.maximumf %73, %74 : vector<8x640xf32>
    %76 = arith.addf %75, %57 : vector<8x640xf32>
    %c0_49 = arith.constant 0 : index
    %c0_50 = arith.constant 0 : index
    %c0_51 = arith.constant 0 : index
    %77 = vector.load %arg17[%c0_49, %c0_50, %c0_51] : memref<1x8x640xf32, #tpu.memory_space<vmem>>, vector<1x8x640xf32>
    %78 = vector.shape_cast %77 : vector<1x8x640xf32> to vector<8x640xf32>
    %79 = vector.shape_cast %76 : vector<8x640xf32> to vector<1x8x640xf32>
    tpu.vector_store %arg17[%c0_49, %c0_50, %c0_51], %79 {strides = array<i32>} : memref<1x8x640xf32, #tpu.memory_space<vmem>>, vector<1x8x640xf32>,
    return
  }
  func.func @transform_0(%arg0: i32, %arg1: i32) -> (i32, i32, i32) {
    %c0_i32 = arith.constant 0 : i32
    %c0_i32_0 = arith.constant 0 : i32
    return %arg0, %c0_i32, %arg1 : i32, i32, i32
  }
  func.func @transform_1(%arg0: i32, %arg1: i32) -> (i32, i32, i32) {
    %c1_i32 = arith.constant 1 : i32
    %0 = arith.subi %arg1, %c1_i32 : i32
    %c0_i32 = arith.constant 0 : i32
    %1 = arith.maxsi %0, %c0_i32 : i32
    %c0_i32_0 = arith.constant 0 : i32
    %c0_i32_1 = arith.constant 0 : i32
    return %arg0, %c0_i32_0, %1 : i32, i32, i32
  }
  func.func @transform_2(%arg0: i32, %arg1: i32) -> (i32, i32, i32) {
    %c0_i32 = arith.constant 0 : i32
    %c0_i32_0 = arith.constant 0 : i32
    return %arg0, %c0_i32, %arg1 : i32, i32, i32
  }
  func.func @transform_3(%arg0: i32, %arg1: i32) -> (i32, i32) {
    %c0_i32 = arith.constant 0 : i32
    %c0_i32_0 = arith.constant 0 : i32
    %c0_i32_1 = arith.constant 0 : i32
    return %c0_i32, %c0_i32_0 : i32, i32
  }
  func.func @transform_4(%arg0: i32, %arg1: i32) -> (i32, i32) {
    %c0_i32 = arith.constant 0 : i32
    %c0_i32_0 = arith.constant 0 : i32
    %c0_i32_1 = arith.constant 0 : i32
    return %c0_i32, %c0_i32_0 : i32, i32
  }
  func.func @transform_5(%arg0: i32, %arg1: i32) -> (i32, i32) {
    %c0_i32 = arith.constant 0 : i32
    %c0_i32_0 = arith.constant 0 : i32
    %c0_i32_1 = arith.constant 0 : i32
    return %c0_i32, %c0_i32_0 : i32, i32
  }
  func.func @transform_6(%arg0: i32, %arg1: i32) -> (i32, i32) {
    %c0_i32 = arith.constant 0 : i32
    %c0_i32_0 = arith.constant 0 : i32
    %c0_i32_1 = arith.constant 0 : i32
    return %c0_i32, %c0_i32_0 : i32, i32
  }
  func.func @transform_7(%arg0: i32, %arg1: i32) -> (i32, i32) {
    %c0_i32 = arith.constant 0 : i32
    %c0_i32_0 = arith.constant 0 : i32
    %c0_i32_1 = arith.constant 0 : i32
    return %c0_i32, %c0_i32_0 : i32, i32
  }
  func.func @transform_8(%arg0: i32, %arg1: i32) -> (i32, i32) {
    %c0_i32 = arith.constant 0 : i32
    %c0_i32_0 = arith.constant 0 : i32
    %c0_i32_1 = arith.constant 0 : i32
    return %c0_i32, %c0_i32_0 : i32, i32
  }
  func.func @transform_9(%arg0: i32, %arg1: i32) -> (i32, i32) {
    %c0_i32 = arith.constant 0 : i32
    %c0_i32_0 = arith.constant 0 : i32
    %c0_i32_1 = arith.constant 0 : i32
    return %c0_i32, %c0_i32_0 : i32, i32
  }
  func.func @transform_10(%arg0: i32, %arg1: i32) -> (i32, i32) {
    %c0_i32 = arith.constant 0 : i32
    %c0_i32_0 = arith.constant 0 : i32
    %c0_i32_1 = arith.constant 0 : i32
    return %c0_i32, %c0_i32_0 : i32, i32
  }
  func.func @transform_11(%arg0: i32, %arg1: i32) -> (i32, i32) {
    %c0_i32 = arith.constant 0 : i32
    %c0_i32_0 = arith.constant 0 : i32
    %c0_i32_1 = arith.constant 0 : i32
    return %c0_i32, %c0_i32_0 : i32, i32
  }
  func.func @transform_12(%arg0: i32, %arg1: i32) -> (i32, i32) {
    %c0_i32 = arith.constant 0 : i32
    %c0_i32_0 = arith.constant 0 : i32
    %c0_i32_1 = arith.constant 0 : i32
    return %c0_i32, %c0_i32_0 : i32, i32
  }
  func.func @transform_13(%arg0: i32, %arg1: i32) -> (i32, i32) {
    %c0_i32 = arith.constant 0 : i32
    %c0_i32_0 = arith.constant 0 : i32
    %c0_i32_1 = arith.constant 0 : i32
    return %c0_i32, %c0_i32_0 : i32, i32
  }
  func.func @transform_14(%arg0: i32, %arg1: i32) -> (i32, i32) {
    %c0_i32 = arith.constant 0 : i32
    %c0_i32_0 = arith.constant 0 : i32
    %c0_i32_1 = arith.constant 0 : i32
    return %c0_i32, %c0_i32_0 : i32, i32
  }
  func.func @transform_15(%arg0: i32, %arg1: i32) -> (i32, i32, i32) {
    %c0_i32 = arith.constant 0 : i32
    %c0_i32_0 = arith.constant 0 : i32
    return %arg0, %c0_i32, %arg1 : i32, i32, i32
  }
}

</mosaic_0001>

<bundles_post_ra>
// kernel: tpu_custom_call.1
= control target key start
LH: loop header
LB: loop body
LE: loop exit
PB: predicated region body
PF: predicated region fallthrough
CT: control target
= control target key end

     0   :  { %s2680_s0 = inlined_call_operand.vmem [shape: bf16[2,8,128], index: 0, kind: input, shape index: {}]   ;;  %s2681_s1 = inlined_call_operand.vmem [shape: bf16[2,8,128], index: 1, kind: input, shape index: {}]   ;;  %s2682_s2 = inlined_call_operand.hbm [shape: bf16[2,8,640], index: 2, kind: input, shape index: {}]   ;;  %s2683_s3 = inlined_call_operand.hbm [shape: f32[128,640], index: 3, kind: input, shape index: {}]   ;;  %s2684_s4 = inlined_call_operand.vmem [shape: f32[8,8], index: 4, kind: input, shape index: {}]   ;;  %s2685_s5 = inlined_call_operand.vmem [shape: f32[8,1], index: 5, kind: input, shape index: {}]   ;;  %s2686_s6 = inlined_call_operand.vmem [shape: f32[8,8], index: 6, kind: input, shape index: {}]   ;;  %s2687_s7 = inlined_call_operand.vmem [shape: f32[8,8], index: 7, kind: input, shape index: {}]   ;;  %s2688_s8 = inlined_call_operand.vmem [shape: f32[8,1], index: 8, kind: input, shape index: {}]   ;;  %s2689_s9 = inlined_call_operand.hbm [shape: f32[8,8], index: 9, kind: input, shape index: {}]   ;;  %s2690_s10 = inlined_call_operand.vmem [shape: f32[8,1], index: 10, kind: input, shape index: {}]   ;;  %s2691_s11 = inlined_call_operand.vmem [shape: f32[8,8], index: 11, kind: input, shape index: {}]   ;;  %s2692_s12 = inlined_call_operand.vmem [shape: f32[8,1], index: 12, kind: input, shape index: {}]   ;;  %s2693_s13 = inlined_call_operand.hbm [shape: f32[8,8], index: 13, kind: input, shape index: {}]   ;;  %s2694_s14 = inlined_call_operand.vmem [shape: f32[8,1], index: 14, kind: input, shape index: {}]   ;;  %s2695_s15 = inlined_call_operand.hbm [shape: f32[2,8,640], index: 15, kind: output, shape index: {}]  }
   0x1   :  { %2701 = sst [smem:[#allocation19_spill]] %s2683_s3 }
   0x2   :  { %2702 = sst [smem:[#allocation20_spill]] %s2689_s9 }
   0x3   :  { %2703 = sst [smem:[#allocation21_spill]] %s2691_s11 }
   0x4   :  { %2704 = sst [smem:[#allocation22_spill]] %s2692_s12 }
   0x5   :  { %2705 = sst [smem:[#allocation23_spill]] %s2693_s13 }
   0x6   :  { %2706 = sst [smem:[#allocation24_spill]] %s2694_s14 }
   0x7   :  { %2707 = sst [smem:[#allocation25_spill]] %s2695_s15 }
   0x8   :  { %20 = vsyncpa [#allocation3], 0 }
   0x9   :  { %22 = vsyncpa [#allocation3 + $0x1], 0 }
   0xa   :  { %23 = vsyncpa [#allocation6], 0 }
   0xb   :  { %24 = vsyncpa [#allocation9], 0 }
   0xc   :  { %25 = vsyncpa [#allocation4], 0 }
   0xd   :  { %27 = vsyncpa [#allocation4 + $0x1], 0  ;;  %s2354_s18 = smov 0   ;;  %s2356_s19 = smov 0  }
   0xe   :  { %s2358_s20 = smov 0   ;;  %s2360_s21 = smov 0  }
   0xf   :  { %s2362_s22 = smov 0   ;;  %s2364_s23 = smov 0  }
  0x10 LB: > { %2708 = sst [smem:[#allocation15_spill]] %s2246_s18  ;;  %s2696_s24 = sadd.s32 4294967295, %s2266_s23   ;;  %s2266_s23 = sphi %s2364_s23, %s33_s23   ;;  %s2262_s22 = sphi %s2362_s22, %s2730_s22   ;;  %s2258_s21 = sphi %s2360_s21, %s2729_s21   ;;  %s2254_s20 = sphi %s2358_s20, %s2733_s20   ;;  %s2250_s19 = sphi %s2356_s19, %s2732_s19   ;;  %s2246_s18 = sphi %s2354_s18, %s2731_s18  }
  0x11   : > { %2709 = sst [smem:[#allocation16_spill]] %s2262_s22  ;;  %p1900_p0 = scmp.ge.s32.totalorder %s2266_s23, 1 }
  0x12   : > { %p2388_p1 = scmp.eq.s32.totalorder %s2696_s24, 0  ;;  %p420_p2 = scmp.lt.s32.totalorder %s2266_s23, 3 }
  0x13   : > { %s2711_s3 = sld [smem:[#allocation19_spill]]  ;;  %s2268_s30 = smov [#allocation5]  }
  0x14   : > { %p2396_p3 = pnand %p1900_p0, %p420_p2  ;;  %s433_s16 = sshll.u32 %s2268_s30, 4  ;;  %s434_s16 = int_to_ptr.vmem [resolvable:$true] %s433_s16 }
  0x15   : > { %p1904_p6 = scmp.ge.s32.totalorder %s2266_s23, 2  ;;  %s2714_s9 = sld [smem:[#allocation20_spill]] }
  0x16   : > { %p1973_p4 = pneg %p2396_p3  ;;  %s2270_s30 = smov 40  }
  0x17   : > { %s2271_s15 = smov [#allocation7]   ;;  %s2715_s13 = sld [smem:[#allocation23_spill]] }
  0x18   : > { %p2404_p5 = pnand %p1973_p4, %p2388_p1  ;;  %s463_s12 = sshll.u32 %s2271_s15, 4  ;;  %s464_s12 = int_to_ptr.vmem [resolvable:$true] %s463_s12 }
  0x19   : > { %s431_s28 = sshll.u32 %s2711_s3, 4  ;;  %s2269_s3 = smov 640   ;;  %s432_s28 = int_to_ptr.hbm [resolvable:$true] %s431_s28 }
  0x1a   : > { %1976 = dma.hbm_to_vmem [thread:$0]  (!%p2404_p5), %s432_s28, 10240, %s434_s16, [#allocation6], %s2269_s3, %s2269_s3, %s2270_s30  }
  0x1b   : > { %s461_s24 = sshll.u32 %s2714_s9, 4  ;;  %s2272_s27 = smov [#allocation8]   ;;  %s462_s24 = int_to_ptr.hbm [resolvable:$true] %s461_s24 }
  0x1c   : > { %1979 = dma.hbm_to_vmem [thread:$0]  (!%p2404_p5), %s462_s24, 128, %s464_s12, [#allocation6]  }
  0x1d   : > { %s482_s26 = sshll.u32 %s2715_s13, 4  ;;  %s484_s9 = sshll.u32 %s2272_s27, 4  ;;  %s483_s26 = int_to_ptr.hbm [resolvable:$true] %s482_s26  ;;  %s485_s9 = int_to_ptr.vmem [resolvable:$true] %s484_s9 }
  0x1e   : > { %1982 = dma.hbm_to_vmem [thread:$0]  (!%p2404_p5), %s483_s26, 128, %s485_s9, [#allocation9]  }
  0x1f   : > { %s1899_s3 = sadd.s32 4294967294, %s2266_s23   ;;  %s45_s15 = sadd.s32 1, %s2262_s22 }
  0x20   : > { %s116_s28 = sadd.s32 1, %s2254_s20  ;;  %p47_p7 = scmp.ge.s32.totalorder %s45_s15, 2 }
  0x21   : > { %p123_p8 = scmp.ne.s32.totalorder %s2254_s20, %s2250_s19  ;;  %p124_p9 = scmp.eq.s32.totalorder %s2266_s23, 0 }
  0x22   : > { %p129_p10 = scmp.ne.s32.totalorder %s2250_s19, %s2246_s18  ;;  %s2735_s15 = smov (%p47_p7, %s45_s15), 0 }
  0x23   : > { %2716 = sst [smem:[#allocation17_spill]] %s2735_s15  ;;  %p2431_p11 = por %p124_p9, %p123_p8 }
  0x24   : > { %p2437_p12 = por %p2388_p1, %p129_p10  ;;  %s111_s12 = ssub.s32 %s2262_s22, %s2735_s15 }
  0x25   : > { %s2719_s14 = sadd.s32 4294967295, %s2266_s23   ;;  %p114_p0 = scmp.eq.s32.totalorder %s111_s12, 0 }
  0x26   : > { %p407_p13 = scmp.eq.s32.totalorder %s2719_s14, 1  ;;  %p413_p2 = scmp.eq.s32.totalorder %s1899_s3, 1 }
  0x27   : > { %p1994_p5 = scmp.lt.s32.totalorder %s2266_s23, 2  ;;  %s524_s30 = sand.u32 1, %s2254_s20  }
  0x28   : > { %p2445_p4 = por %p407_p13, %p123_p8  ;;  %p2453_p7 = por %p413_p2, %p129_p10 }
  0x29   : > { %s2451_s16 = scalar_select %p114_p0, %s2254_s20, %s116_s28  }
  0x2a   : > { %s1952_s26 = smul.u32 20, %s524_s30  ;;  %p1984_p9 = pnand %p1994_p5, %p2431_p11 }
  0x2b   : > { %2721 = sst [smem:[#allocation18_spill]] %s2451_s16  ;;  %s1953_s27 = smul.u32 20, %s2262_s22 }
  0x2c   : > { %s528_s12 = scalar_lea.vmem [#allocation2], %s1952_s26  ;;  %s525_s28 = scalar_lea.sflag [#allocation3], %s524_s30 }
  0x2d   : > { %s535_s3 = scalar_lea.hbm %s2682_s2, %s1953_s27  ;;  %s539_s15 = sshll.u32 %s528_s12, 4  ;;  %s540_s15 = int_to_ptr.vmem [resolvable:$true] %s539_s15 }
  0x2e   : > { %s537_s18 = sshll.u32 %s535_s3, 4  ;;  %548 = sbr.rel (%p2396_p3) target bundleno = 1028 (0x404), region = 80  ;;  %s538_s18 = int_to_ptr.hbm [resolvable:$true] %s537_s18 }
  0x2f   : > { %1986 = dma.hbm_to_vmem [thread:$0]  (!%p1984_p9), %s538_s18, 320, %s540_s15, %s525_s28  }
  0x30   : > { %s2467_s16 = sand.u32 (!%p2396_p3), 1, %s2250_s19  }
  0x31   : > { %s1954_s11 = smul.u32 (!%p2396_p3), 20, %s2467_s16  ;;  %s551_s22 = scalar_lea.sflag (!%p2396_p3), [#allocation3], %s2467_s16 }
  0x33   : > { %s2471_s13 = scalar_lea.vmem [#allocation2], %s1954_s11 }
  0x34   : > { %2229 = dma.done.wait (%p2437_p12), %s551_s22, 320  }
  0x35   : > { %2231 = vsyncadd (%p2437_p12), %s551_s22, 4294966976 }
  0x36   : > { %2233 = dma.done.wait (%p2388_p1), [#allocation6], 10368  }
  0x37   : > { %2235 = vsyncadd (%p2388_p1), [#allocation6], 4294956928 }
  0x38   : > { %2237 = dma.done.wait (%p2388_p1), [#allocation9], 128  }
  0x39   : > { %2239 = vsyncadd (%p2388_p1), [#allocation9], 4294967168  ;;  %p634_p3 = scmp.lt.s32.totalorder %s2258_s21, 1  ;;  %v2273_v0 = vmov 0   ;;  %v737_v2 = vld [vmem:[%s2685_s5] sm:$0xff]  ;;  %vm776_vm0 = vcmask 64512  }
  0x3a   : > { %2053 = vset.pattern.permute.xlu0 %v2273_v0  ;;  %2054 = vset.pattern.permute.xlu1 %v2273_v0  ;;  %v2496_v4 = vld [vmem:[%s2684_s4] sm:$0xff]  ;;  %v726_v6 = vld [vmem:[#allocation5 + $0x230] sm:$0xff]  ;;  %v721_v7 = vld [vmem:[#allocation5 + $0x208] sm:$0xff]  ;;  %v747_v9 = vmax.f32 %v737_v2, 0.0  ;;  %s2723_s25 = sld [smem:[#allocation24_spill]] }
  0x3b   : > { %s635_s18 = scalar_select %p634_p3, %s2258_s21, 1  ;;  %2055 = vset.pattern.permute.xlu2 %v2273_v0  ;;  %773 = vperm.xlu0 %2053, %v737_v2   ;;  %v731_v5 = vld [vmem:[#allocation5 + $0x258] sm:$0xff]  ;;  %v716_v10 = vld [vmem:[#allocation5 + $0x1e0] sm:$0xff]  ;;  %v733_v13 = vld [vmem:[#allocation5 + $0x268] sm:$0xff] }
  0x3c   : > { %831 = vmatpush.msra.mxu2 %v731_v5  ;;  %v732_v12 = vld [vmem:[#allocation5 + $0x260] sm:$0xff]  ;;  %v734_v14 = vld [vmem:[#allocation5 + $0x270] sm:$0xff]  ;;  %v727_v15 = vld [vmem:[#allocation5 + $0x238] sm:$0xff]  ;;  %s2724_s3 = sld [smem:[#allocation21_spill]] }
  0x3d   : > { %s1910_s22 = sshll.u32 %s635_s18, 2  ;;  %851 = vmatpush.msra.mxu3 %v732_v12  ;;  %v711_v16 = vld [vmem:[#allocation5 + $0x1b8] sm:$0xff]  ;;  %v728_v17 = vld [vmem:[#allocation5 + $0x240] sm:$0xff]  ;;  %v729_v18 = vld [vmem:[#allocation5 + $0x248] sm:$0xff]  ;;  %s2725_s11 = sld [smem:[#allocation22_spill]] }
  0x3e   : > { %s640_s9 = scalar_lea.vmem %s2680_s0, %s1910_s22  ;;  %s650_s12 = scalar_lea.vmem %s2681_s1, %s1910_s22  ;;  %832 = vmatpush.msra.mxu2 %v726_v6  ;;  %v722_v19 = vld [vmem:[#allocation5 + $0x210] sm:$0xff]  ;;  %v723_v21 = vld [vmem:[#allocation5 + $0x218] sm:$0xff]  ;;  %v724_v22 = vld [vmem:[#allocation5 + $0x220] sm:$0xff] }
  0x3f   : > { %v759_v1 = vld [vmem:[%s640_s9] sm:$0xf]  ;;  %v706_v20 = vld [vmem:[#allocation5 + $0x190] sm:$0xff]  ;;  %852 = vmatpush.msra.mxu3 %v727_v15  ;;  %v717_v23 = vld [vmem:[#allocation5 + $0x1e8] sm:$0xff]  ;;  %s1956_s22 = smul.u32 40, %s2258_s21  ;;  %s2726_s9 = sld [smem:[#allocation25_spill]] }
  0x40   : > { %v760_v3 = vunpack.c.l.bf16 %v759_v1  ;;  %v769_v8 = vld [vmem:[%s650_s12] sm:$0xf]  ;;  %833 = vmatpush.msra.mxu2 %v721_v7  ;;  %v701_v24 = vld [vmem:[#allocation5 + $0x168] sm:$0xff]  ;;  %v718_v25 = vld [vmem:[#allocation5 + $0x1f0] sm:$0xff] }
  0x41   : > { %v770_v11 = vunpack.c.l.bf16 %v769_v8  ;;  %853 = vmatpush.msra.mxu3 %v722_v19  ;;  %v719_v26 = vld [vmem:[#allocation5 + $0x1f8] sm:$0xff]  ;;  %v712_v27 = vld [vmem:[#allocation5 + $0x1c0] sm:$0xff]  ;;  %v713_v29 = vld [vmem:[#allocation5 + $0x1c8] sm:$0xff] }
  0x42   : > { %825 = vmatpush.msra.mxu1 %v760_v3  ;;  %834 = vmatpush.msra.mxu2 %v716_v10  ;;  %v696_v28 = vld [vmem:[#allocation5 + $0x140] sm:$0xff]  ;;  %v714_v30 = vld [vmem:[#allocation5 + $0x1d0] sm:$0xff]  ;;  %v707_v31 = vld [vmem:[#allocation5 + $0x198] sm:$0xff] }
  0x43   : > { %1913 = vmatmul.msk.f32.vlgmr.msra.gmra.mxu1 %vm776_vm0, %v2496_v4  ;;  %795 = vmatpush.msra.mxu0 %v770_v11  ;;  %v691_v32 = vld [vmem:[#allocation5 + $0x118] sm:$0xff]  ;;  %v708_v33 = vld [vmem:[#allocation5 + $0x1a0] sm:$0xff]  ;;  %v709_v34 = vld [vmem:[#allocation5 + $0x1a8] sm:$0xff] }
  0x44   : > { %891 = vmatpush.msrb.mxu1 %v734_v14  ;;  %943 = vperm.xlu0 %2053, %v747_v9   ;;  %v702_v35 = vld [vmem:[#allocation5 + $0x170] sm:$0xff]  ;;  %v703_v37 = vld [vmem:[#allocation5 + $0x178] sm:$0xff]  ;;  %v704_v38 = vld [vmem:[#allocation5 + $0x180] sm:$0xff] }
  0x45   : > { %871 = vmatpush.msrb.mxu0 %v733_v13  ;;  %835 = vmatpush.msra.mxu2 %v711_v16  ;;  %v686_v36 = vld [vmem:[#allocation5 + $0xf0] sm:$0xff]  ;;  %v697_v39 = vld [vmem:[#allocation5 + $0x148] sm:$0xff]  ;;  %v699_v42 = vld [vmem:[#allocation5 + $0x158] sm:$0xff]  ;;  %s1750_s30 = scalar_lea.hbm %s2726_s9, %s1956_s22  ;;  %s2196_s28 = scalar_lea.hbm %s2726_s9, 80 }
  0x46   : > { %892 = vmatpush.msrb.mxu1 %v729_v18  ;;  %854 = vmatpush.msra.mxu3 %v717_v23  ;;  %v681_v40 = vld [vmem:[#allocation5 + $0xc8] sm:$0xff]  ;;  %v698_v41 = vld [vmem:[#allocation5 + $0x150] sm:$0xff]  ;;  %v692_v43 = vld [vmem:[#allocation5 + $0x120] sm:$0xff]  ;;  %s1754_s26 = sshll.u32 %s1750_s30, 4  ;;  %s1755_s26 = int_to_ptr.hbm [resolvable:$true] %s1754_s26 }
  0x47   : > { %872 = vmatpush.msrb.mxu0 %v728_v17  ;;  %836 = vmatpush.msra.mxu2 %v706_v20  ;;  %v676_v44 = vld [vmem:[#allocation5 + $0xa0] sm:$0xff]  ;;  %v693_v45 = vld [vmem:[#allocation5 + $0x128] sm:$0xff]  ;;  %v694_v46 = vld [vmem:[#allocation5 + $0x130] sm:$0xff]  ;;  %s2190_s27 = sshra.s32 %s1755_s26, 4  ;;  %s2191_s27 = int_to_ptr.hbm [resolvable:$true] %s2190_s27 }
  0x48   : > { %893 = vmatpush.msrb.mxu1 %v724_v22  ;;  %855 = vmatpush.msra.mxu3 %v712_v27  ;;  %v671_v47 = vld [vmem:[#allocation5 + $0x78] sm:$0xff]  ;;  %v666_v48 = vld [vmem:[#allocation5 + $0x50] sm:$0xff]  ;;  %v661_v49 = vld [vmem:[#allocation5 + $0x28] sm:$0xff]  ;;  %s2192_s14 = scalar_lea.hbm %s2191_s27, 40  ;;  %p2197_p11 = scmp.lt.s32.totalorder %s2191_s27, %s2726_s9 }
  0x49   : > { %873 = vmatpush.msrb.mxu0 %v723_v21  ;;  %837 = vmatpush.msra.mxu2 %v701_v24  ;;  %v656_v50 = vld [vmem:[#allocation5] sm:$0xff]  ;;  %v735_v51 = vld [vmem:[#allocation5 + $0x278] sm:$0xff]  ;;  %v730_v52 = vld [vmem:[#allocation5 + $0x250] sm:$0xff]  ;;  %p2193_p1 = scmp.ne.s32.totalorder %s2191_s27, %s2192_s14  ;;  %p2198_p12 = scmp.lt.s32.totalorder %s2196_s28, %s2192_s14 }
  0x4a   : > { %894 = vmatpush.msrb.mxu1 %v719_v26  ;;  %856 = vmatpush.msra.mxu3 %v707_v31  ;;  %v725_v53 = vld [vmem:[#allocation5 + $0x228] sm:$0xff]  ;;  %v720_v54 = vld [vmem:[#allocation5 + $0x200] sm:$0xff]  ;;  %v715_v55 = vld [vmem:[#allocation5 + $0x1d8] sm:$0xff] }
  0x4b   : > { %874 = vmatpush.msrb.mxu0 %v718_v25  ;;  %838 = vmatpush.msra.mxu2 %v696_v28  ;;  %v687_v56 = vld [vmem:[#allocation5 + $0xf8] sm:$0xff]  ;;  %v688_v57 = vld [vmem:[#allocation5 + $0x100] sm:$0xff]  ;;  %v689_v58 = vld [vmem:[#allocation5 + $0x108] sm:$0xff]  ;;  %p2194_p8 = pnand %p2193_p1, %p2445_p4  ;;  %p2199_p13 = por %p2198_p12, %p2197_p11 }
  0x4c   : > { %895 = vmatpush.msrb.mxu1 %v714_v30  ;;  %857 = vmatpush.msra.mxu3 %v702_v35  ;;  %v710_v59 = vld [vmem:[#allocation5 + $0x1b0] sm:$0xff]  ;;  %v683_v61 = vld [vmem:[#allocation5 + $0xd8] sm:$0xff]  ;;  %v684_v62 = vld [vmem:[#allocation5 + $0xe0] sm:$0xff] }
  0x4d   : > { %875 = vmatpush.msrb.mxu0 %v713_v29  ;;  %839 = vmatpush.msra.mxu2 %v691_v32  ;;  %v682_v60 = vld [vmem:[#allocation5 + $0xd0] sm:$0xff]  ;;  %v705_v63 = vld [vmem:[#allocation5 + $0x188] sm:$0xff]  ;;  %v679_v2 = vld [vmem:[#allocation5 + $0xb8] sm:$0xff]  ;;  %p2195_p10 = pneg %p2194_p8 }
  0x4e   : > { %896 = vmatpush.msrb.mxu1 %v709_v34  ;;  %858 = vmatpush.msra.mxu3 %v697_v39  ;;  %v677_v0 = vld [vmem:[#allocation5 + $0xa8] sm:$0xff]  ;;  %v678_v1 = vld [vmem:[#allocation5 + $0xb0] sm:$0xff]  ;;  %v700_v3 = vld [vmem:[#allocation5 + $0x160] sm:$0xff] }
  0x4f   : > { %876 = vmatpush.msrb.mxu0 %v708_v33  ;;  %840 = vmatpush.msra.mxu2 %v686_v36  ;;  %v673_v5 = vld [vmem:[#allocation5 + $0x88] sm:$0xff]  ;;  %v674_v6 = vld [vmem:[#allocation5 + $0x90] sm:$0xff]  ;;  %v695_v7 = vld [vmem:[#allocation5 + $0x138] sm:$0xff]  ;;  %p2200_p0 = pnand %p2199_p13, %p2195_p10 }
  0x50   : > { %897 = vmatpush.msrb.mxu1 %v704_v38  ;;  %859 = vmatpush.msra.mxu3 %v692_v43  ;;  %v667_v8 = vld [vmem:[#allocation5 + $0x58] sm:$0xff]  ;;  %v668_v9 = vld [vmem:[#allocation5 + $0x60] sm:$0xff]  ;;  %v669_v10 = vld [vmem:[#allocation5 + $0x68] sm:$0xff] }
  0x51   : > { %877 = vmatpush.msrb.mxu0 %v703_v37  ;;  %841 = vmatpush.msra.mxu2 %v681_v40  ;;  %v690_v11 = vld [vmem:[#allocation5 + $0x110] sm:$0xff]  ;;  %v663_v13 = vld [vmem:[#allocation5 + $0x38] sm:$0xff]  ;;  %v664_v14 = vld [vmem:[#allocation5 + $0x40] sm:$0xff]  ;;  %v748_v40 = vlaneseq }
  0x52   : > { %898 = vmatpush.msrb.mxu1 %v699_v42  ;;  %1912 = vmatmul.msk.f32.vlgmr.msra.gmra.mxu0 %vm776_vm0, %v2496_v4  ;;  %v672_v4 = vld [vmem:[#allocation5 + $0x80] sm:$0xff]  ;;  %v662_v12 = vld [vmem:[#allocation5 + $0x30] sm:$0xff]  ;;  %v685_v15 = vld [vmem:[#allocation5 + $0xe8] sm:$0xff] }
  0x53   : > { %878 = vmatpush.msrb.mxu0 %v698_v41  ;;  %842 = vmatpush.msra.mxu2 %v676_v44  ;;  %v657_v16 = vld [vmem:[#allocation5 + $0x8] sm:$0xff]  ;;  %v658_v17 = vld [vmem:[#allocation5 + $0x10] sm:$0xff]  ;;  %v659_v18 = vld [vmem:[#allocation5 + $0x18] sm:$0xff]  ;;  %v749_v42 = vand.u32 127, %v748_v40 }
  0x54   : > { %899 = vmatpush.msrb.mxu1 %v694_v46  ;;  %860 = vmatpush.msra.mxu3 %v687_v56  ;;  %v680_v19 = vld [vmem:[#allocation5 + $0xc0] sm:$0xff]  ;;  %v675_v20 = vld [vmem:[#allocation5 + $0x98] sm:$0xff]  ;;  %v670_v21 = vld [vmem:[#allocation5 + $0x70] sm:$0xff] }
  0x55   : > { %879 = vmatpush.msrb.mxu0 %v693_v45  ;;  %843 = vmatpush.msra.mxu2 %v671_v47  ;;  %v665_v22 = vld [vmem:[#allocation5 + $0x48] sm:$0xff]  ;;  %v660_v23 = vld [vmem:[#allocation5 + $0x20] sm:$0xff]  ;;  %v739_v35 = vld [vmem:[%s2687_s7] sm:$0xff]  ;;  %vm754_vm1 = vcmp.eq.s32.totalorder %v749_v42, 0 }
  0x56   : > { %900 = vmatpush.msrb.mxu1 %v689_v58  ;;  %861 = vmatpush.msra.mxu3 %v682_v60  ;;  %v761_v24 = vld [vmem:[%s2471_s13] sm:$0xff]  ;;  %v763_v29 = vld [vmem:[%s2471_s13 + $0x10] sm:$0xf]  ;;  %v762_v30 = vld [vmem:[%s2471_s13 + $0x8] sm:$0xff]  ;;  %s1955_s13 = smul.u32 40, %s2467_s16 }
  0x57   : > { %844 = vmatpush.msra.mxu2 %v666_v48  ;;  %880 = vmatpush.msrb.mxu0 %v688_v57  ;;  %v765_v25 = vunpack.c.h.bf16 %v761_v24  ;;  %v764_v26 = vunpack.c.l.bf16 %v761_v24  ;;  %v768_v33 = vunpack.c.l.bf16 %v763_v29  ;;  %v767_v34 = vunpack.c.h.bf16 %v762_v30  ;;  %v740_v38 = vld [vmem:[%s2688_s8] sm:$0xff] }
  0x58   : > { %901 = vmatpush.msrb.mxu1 %v684_v62  ;;  %862 = vmatpush.msra.mxu3 %v677_v0  ;;  %v766_v37 = vunpack.c.l.bf16 %v762_v30  ;;  %v742_v39 = vld [vmem:[%s2690_s10] sm:$0xff]  ;;  %s2626_s18 = scalar_lea.vmem [#allocation10], %s1955_s13 }
  0x59   : > { %845 = vmatpush.msra.mxu2 %v661_v49  ;;  %881 = vmatpush.msrb.mxu0 %v683_v61  ;;  %v738_v41 = vld [vmem:[%s2686_s6] sm:$0xff]  ;;  %s1752_s21 = sshll.u32 %s2626_s18, 4  ;;  %s1753_s21 = int_to_ptr.vmem [resolvable:$true] %s1752_s21 }
  0x5a   : > { %902 = vmatpush.msrb.mxu1 %v679_v2  ;;  %863 = vmatpush.msra.mxu3 %v672_v4 }
  0x5b   : > { %846 = vmatpush.msra.mxu2 %v656_v50  ;;  %882 = vmatpush.msrb.mxu0 %v678_v1 }
  0x5c   : > { %903 = vmatpush.msrb.mxu1 %v674_v6  ;;  %864 = vmatpush.msra.mxu3 %v667_v8  ;;  %v746_v8 = vld [vmem:[%s2723_s25] sm:$0xff]  ;;  %s1737_s25 = scalar_lea.sflag [#allocation4], %s2467_s16 }
  0x5d   : > { %911 = vmatpush.msrb.mxu2 %v735_v51  ;;  %883 = vmatpush.msrb.mxu0 %v673_v5 }
  0x5e   : > { %904 = vmatpush.msrb.mxu1 %v669_v10  ;;  %865 = vmatpush.msra.mxu3 %v662_v12 }
  0x5f   : > { %912 = vmatpush.msrb.mxu2 %v730_v52  ;;  %884 = vmatpush.msrb.mxu0 %v668_v9 }
  0x60   : > { %905 = vmatpush.msrb.mxu1 %v664_v14  ;;  %866 = vmatpush.msra.mxu3 %v657_v16  ;;  %v743_v16 = vld [vmem:[%s2724_s3] sm:$0xff] }
  0x61   : > { %913 = vmatpush.msrb.mxu2 %v725_v53  ;;  %885 = vmatpush.msrb.mxu0 %v663_v13 }
  0x62   : > { %906 = vmatpush.msrb.mxu1 %v659_v18  ;;  %969 = vmatpush.msrb.mxu3 %v764_v26 }
  0x63   : > { %914 = vmatpush.msrb.mxu2 %v720_v54  ;;  %886 = vmatpush.msrb.mxu0 %v658_v17  ;;  %v744_v17 = vld [vmem:[%s2725_s11] sm:$0xff] }
  0x64   : > { %1009 = vmatpush.msra.mxu1 %v766_v37  ;;  %1159 = vperm.xlu1 %2054, %v740_v38  }
  0x65   : > { %915 = vmatpush.msrb.mxu2 %v715_v55  ;;  %989 = vmatpush.msra.mxu0 %v765_v25 }
  0x66   : > { %1395 = vperm.xlu2 %2055, %v746_v8  }
  0x67   : > { %916 = vmatpush.msrb.mxu2 %v710_v59  ;;  %v741_v59 = vld [vmem:[#allocation7] sm:$0xff] }
  0x69   : > { %917 = vmatpush.msrb.mxu2 %v705_v63 }
  0x6b   : > { %918 = vmatpush.msrb.mxu2 %v700_v3 }
  0x6c   : > { %1169 = vperm.xlu1 %2054, %v742_v39  }
  0x6d   : > { %919 = vmatpush.msrb.mxu2 %v695_v7 }
  0x6e   : > { %1282 = vperm.xlu2 %2055, %v744_v17  }
  0x6f   : > { %920 = vmatpush.msrb.mxu2 %v690_v11 }
  0x71   : > { %921 = vmatpush.msrb.mxu2 %v685_v15 }
  0x73   : > { %922 = vmatpush.msrb.mxu2 %v680_v19 }
  0x75   : > { %923 = vmatpush.msrb.mxu2 %v675_v20 }
  0x77   : > { %924 = vmatpush.msrb.mxu2 %v670_v21 }
  0x79   : > { %925 = vmatpush.msrb.mxu2 %v665_v22 }
  0x7b   : > { %926 = vmatpush.msrb.mxu2 %v660_v23  ;;  %v2551_v23 = vld [vmem:[#allocation8] sm:$0xff] }
  0xad   : > { %v774_v27 = vpop.permute.xlu0 %773 }
  0xb6   : > { %v944_v44 = vpop.permute.xlu0 %943 }
  0xc0   : > { %v827_v28 = vpop.f32.mrf.mxu1 }
  0xc1   : > { %v828_v31 = vadd.f32 %v827_v28, %v774_v27 }
  0xc3   : > { %v830_v32 = vmax.f32 %v828_v31, 0.0 }
  0xc5   : > { %847 = vmatmul.f32.vlgmr.msra.gmra.mxu2 %v830_v32  ;;  %867 = vmatmul.f32.vlgmr.msra.gmra.mxu3 %v830_v32 }
  0xc6   : > { %887 = vmatmul.f32.vlgmr.msrb.gmra.mxu0 %v830_v32  ;;  %907 = vmatmul.f32.vlgmr.msrb.gmra.mxu1 %v830_v32 }
  0xc7   : > { %1049 = vmatpush.msrb.mxu0 %v768_v33  ;;  %1029 = vmatpush.msra.mxu3 %v767_v34 }
  0xcd   : > { %927 = vmatmul.f32.vlgmr.msrb.gmra.mxu2 %v830_v32  ;;  %1914 = vmatmul.msk.f32.vlgmr.msrb.gmra.mxu3 %vm776_vm0, %v739_v35 }
  0xce   : > { %1915 = vmatmul.msk.f32.vlgmr.msra.gmra.mxu0 %vm776_vm0, %v739_v35  ;;  %1916 = vmatmul.msk.f32.vlgmr.msra.gmra.mxu1 %vm776_vm0, %v739_v35 }
  0xcf   : > { %v797_v36 = vpop.f32.mrf.mxu0 }
  0xd0   : > { %v2579_v36 = vpop.permute.xlu2 %1395 }
  0xd5   : > { %1917 = vmatmul.msk.f32.vlgmr.msra.gmra.mxu3 %vm776_vm0, %v739_v35 }
  0xd6   : > { %1918 = vmatmul.msk.f32.vlgmr.msrb.gmra.mxu0 %vm776_vm0, %v739_v35  ;;  %v1160_v55 = vpop.permute.xlu1 %1159 }
  0xd8   : > { %v1283_v17 = vpop.permute.xlu2 %1282 }
  0xde   : > { %v1170_v9 = vpop.permute.xlu1 %1169 }
 0x143   : > { %v888_v43 = vpop.f32.mrf.mxu0  ;;  %v908_v48 = vpop.f32.mrf.mxu1 }
 0x144   : > { %1112 = vmatpush.msra.mxu0 %v888_v43 }
 0x145   : > { %1921 = vmatmul.msk.f32.vlgmr.msra.gmra.mxu0 %vm776_vm0, %v738_v41 }
 0x148   : > { %v848_v45 = vpop.f32.mrf.mxu2  ;;  %v868_v46 = vpop.f32.mrf.mxu3 }
 0x149   : > { %v946_v47 = vsel %vm754_vm1, %v944_v44, %v848_v45  ;;  %1092 = vmatpush.msrb.mxu3 %v868_v46 }
 0x14a   : > { %1072 = vmatpush.msrb.mxu1 %v946_v47  ;;  %1920 = vmatmul.msk.f32.vlgmr.msrb.gmra.mxu3 %vm776_vm0, %v738_v41 }
 0x14b   : > { %1919 = vmatmul.msk.f32.vlgmr.msrb.gmra.mxu1 %vm776_vm0, %v738_v41  ;;  %v991_v50 = vpop.f32.mrf.mxu0  ;;  %v1011_v53 = vpop.f32.mrf.mxu1 }
 0x14c   : > { %1132 = vmatpush.msra.mxu1 %v908_v48 }
 0x150   : > { %v928_v49 = vpop.f32.mrf.mxu2  ;;  %v971_v52 = vpop.f32.mrf.mxu3 }
 0x151   : > { %1152 = vmatpush.msra.mxu3 %v928_v49 }
 0x152   : > { %1923 = vmatmul.msk.f32.vlgmr.msra.gmra.mxu3 %vm776_vm0, %v738_v41 }
 0x153   : > { %1922 = vmatmul.msk.f32.vlgmr.msra.gmra.mxu1 %vm776_vm0, %v738_v41  ;;  %v1051_v51 = vpop.f32.mrf.mxu0 }
 0x158   : > { %v1031_v57 = vpop.f32.mrf.mxu3 }
 0x1c2   : > { %v1114_v54 = vpop.f32.mrf.mxu0 }
 0x1c3   : > { %v1115_v56 = vadd.f32 %v1114_v54, %v1011_v53 }
 0x1c5   : > { %v1164_v58 = vadd.f32 %v1160_v55, %v1115_v56 }
 0x1c7   : > { %1230 = vmatpush.msra.mxu2 %v1164_v58 }
 0x1c8   : > { %1926 = vmatmul.msk.f32.vlgmr.msra.gmra.mxu2 %vm776_vm0, %v741_v59  ;;  %v1074_v60 = vpop.f32.mrf.mxu1 }
 0x1c9   : > { %v1075_v61 = vadd.f32 %v1074_v60, %v971_v52 }
 0x1cb   : > { %v1162_v62 = vadd.f32 %v1160_v55, %v1075_v61 }
 0x1cd   : > { %v1094_v63 = vpop.f32.mrf.mxu3  ;;  %1190 = vmatpush.msrb.mxu0 %v1162_v62 }
 0x1ce   : > { %v1095_v0 = vadd.f32 %v1094_v63, %v991_v50  ;;  %1924 = vmatmul.msk.f32.vlgmr.msrb.gmra.mxu0 %vm776_vm0, %v741_v59 }
 0x1d0   : > { %v1163_v1 = vadd.f32 %v1160_v55, %v1095_v0  ;;  %v1134_v2 = vpop.f32.mrf.mxu1 }
 0x1d1   : > { %v1135_v3 = vadd.f32 %v1134_v2, %v1031_v57 }
 0x1d2   : > { %1210 = vmatpush.msrb.mxu1 %v1163_v1 }
 0x1d3   : > { %v1165_v4 = vadd.f32 %v1160_v55, %v1135_v3  ;;  %1925 = vmatmul.msk.f32.vlgmr.msrb.gmra.mxu1 %vm776_vm0, %v741_v59 }
 0x1d5   : > { %v1154_v5 = vpop.f32.mrf.mxu3  ;;  %1250 = vmatpush.msrb.mxu3 %v1165_v4 }
 0x1d6   : > { %v1155_v6 = vadd.f32 %v1154_v5, %v1051_v51  ;;  %1927 = vmatmul.msk.f32.vlgmr.msrb.gmra.mxu3 %vm776_vm0, %v741_v59 }
 0x1d8   : > { %v1166_v7 = vadd.f32 %v1160_v55, %v1155_v6 }
 0x1da   : > { %1270 = vmatpush.msra.mxu0 %v1166_v7 }
 0x1db   : > { %1928 = vmatmul.msk.f32.vlgmr.msra.gmra.mxu0 %vm776_vm0, %v741_v59 }
 0x24b   : > { %v1232_v10 = vpop.f32.mrf.mxu2  ;;  %v1192_v11 = vpop.f32.mrf.mxu0 }
 0x24c   : > { %v1233_v12 = vadd.f32 %v1232_v10, %v1170_v9  ;;  %v1193_v13 = vadd.f32 %v1192_v11, %v1170_v9 }
 0x24e   : > { %v1277_v14 = vmax.f32 %v1233_v12, 0.0  ;;  %v1275_v15 = vmax.f32 %v1193_v13, 0.0 }
 0x250   : > { %1343 = vmatpush.msra.mxu3 %v1277_v14  ;;  %v1212_v18 = vpop.f32.mrf.mxu1  ;;  %1303 = vmatpush.msra.mxu1 %v1275_v15  ;;  %v2546_v21 = vadd.f32 %v1275_v15, %v1275_v15  ;;  %v1390_v31 = vadd.f32 %v1277_v14, %v1277_v14 }
 0x251   : > { %v1213_v19 = vadd.f32 %v1212_v18, %v1170_v9  ;;  %1931 = vmatmul.msk.f32.vlgmr.msra.gmra.mxu3 %vm776_vm0, %v743_v16  ;;  %1929 = vmatmul.msk.f32.vlgmr.msra.gmra.mxu1 %vm776_vm0, %v743_v16 }
 0x253   : > { %v1276_v20 = vmax.f32 %v1213_v19, 0.0 }
 0x255   : > { %v2548_v22 = vadd.f32 %v1276_v20, %v1276_v20  ;;  %1323 = vmatpush.msrb.mxu2 %v1276_v20 }
 0x256   : > { %1930 = vmatmul.msk.f32.vlgmr.msrb.gmra.mxu2 %vm776_vm0, %v743_v16 }
 0x257   : > { %1416 = vmatpush.msra.mxu2 %v2546_v21  ;;  %1436 = vmatpush.msrb.mxu3 %v2548_v22 }
 0x258   : > { %v1272_v24 = vpop.f32.mrf.mxu0 }
 0x259   : > { %v1273_v25 = vadd.f32 %v1272_v24, %v1170_v9  ;;  %1935 = vmatmul.msk.f32.vlgmr.msrb.gmra.mxu3 %vm776_vm0, %v2551_v23  ;;  %v1252_v26 = vpop.f32.mrf.mxu3 }
 0x25a   : > { %v1253_v27 = vadd.f32 %v1252_v26, %v1170_v9 }
 0x25b   : > { %v1279_v28 = vmax.f32 %v1273_v25, 0.0 }
 0x25c   : > { %v1278_v29 = vmax.f32 %v1253_v27, 0.0 }
 0x25d   : > { %v2557_v30 = vadd.f32 %v1279_v28, %v1279_v28  ;;  %1383 = vmatpush.msrb.mxu1 %v1279_v28 }
 0x25e   : > { %v2559_v32 = vadd.f32 %v1278_v29, %v1278_v29  ;;  %1363 = vmatpush.msrb.mxu0 %v1278_v29  ;;  %1933 = vmatmul.msk.f32.vlgmr.msrb.gmra.mxu1 %vm776_vm0, %v743_v16 }
 0x25f   : > { %1934 = vmatmul.msk.f32.vlgmr.msra.gmra.mxu2 %vm776_vm0, %v2551_v23  ;;  %1932 = vmatmul.msk.f32.vlgmr.msrb.gmra.mxu0 %vm776_vm0, %v743_v16 }
 0x260   : > { %1456 = vmatpush.msra.mxu0 %v1390_v31  ;;  %1496 = vmatpush.msrb.mxu2 %v2557_v30 }
 0x261   : > { %1476 = vmatpush.msra.mxu1 %v2559_v32 }
 0x266   : > { %1937 = vmatmul.msk.f32.vlgmr.msra.gmra.mxu1 %vm776_vm0, %v2551_v23 }
 0x267   : > { %1938 = vmatmul.msk.f32.vlgmr.msrb.gmra.mxu2 %vm776_vm0, %v2551_v23  ;;  %1936 = vmatmul.msk.f32.vlgmr.msra.gmra.mxu0 %vm776_vm0, %v2551_v23 }
 0x2ce   : > { %v2573_v33 = vpop.f32.mrf.mxu1 }
 0x2cf   : > { %v1306_v24 = vadd.f32 %v2573_v33, %v1283_v17 }
 0x2d4   : > { %v2575_v34 = vpop.f32.mrf.mxu3 }
 0x2d5   : > { %v1346_v27 = vadd.f32 %v2575_v34, %v1283_v17 }
 0x2d9   : > { %v2577_v35 = vpop.f32.mrf.mxu2 }
 0x2da   : > { %v1326_v18 = vadd.f32 %v2577_v35, %v1283_v17 }
 0x2db   : > { %v2581_v37 = vpop.f32.mrf.mxu1 }
 0x2dc   : > { %v1438_v38 = vpop.f32.mrf.mxu3  ;;  %v2583_v39 = vpop.f32.mrf.mxu0 }
 0x2dd   : > { %v1439_v40 = vadd.f32 %v1438_v38, %v2579_v36  ;;  %v1366_v34 = vadd.f32 %v2583_v39, %v1283_v17 }
 0x2df   : > { %v1502_v41 = vmax.f32 %v1439_v40, 0.0  ;;  %v1386_v40 = vadd.f32 %v2581_v37, %v1283_v17 }
 0x2e1   : > { %v1507_v42 = vadd.f32 %v1502_v41, %v2548_v22 }
 0x2e2   : > { %v1418_v43 = vpop.f32.mrf.mxu2 }
 0x2e3   : > { %v1419_v44 = vadd.f32 %v1418_v43, %v2579_v36  ;;  %1546 = vmatpush.msrb.mxu0 %v1507_v42  ;;  %v1478_v45 = vpop.f32.mrf.mxu1 }
 0x2e4   : > { %v1479_v46 = vadd.f32 %v1478_v45, %v2579_v36  ;;  %1940 = vmatmul.msk.f32.vlgmr.msrb.gmra.mxu0 %vm776_vm0, %v2551_v23  ;;  %v1458_v47 = vpop.f32.mrf.mxu0 }
 0x2e5   : > { %v1501_v48 = vmax.f32 %v1419_v44, 0.0  ;;  %v1459_v49 = vadd.f32 %v1458_v47, %v2579_v36 }
 0x2e6   : > { %v1504_v50 = vmax.f32 %v1479_v46, 0.0 }
 0x2e7   : > { %v1506_v51 = vadd.f32 %v1501_v48, %v2546_v21  ;;  %v1503_v52 = vmax.f32 %v1459_v49, 0.0 }
 0x2e8   : > { %v1509_v53 = vadd.f32 %v1504_v50, %v2559_v32 }
 0x2e9   : > { %v1508_v54 = vadd.f32 %v1503_v52, %v1390_v31  ;;  %1526 = vmatpush.msra.mxu3 %v1506_v51 }
 0x2ea   : > { %v1498_v55 = vpop.f32.mrf.mxu2  ;;  %1939 = vmatmul.msk.f32.vlgmr.msra.gmra.mxu3 %vm776_vm0, %v2551_v23  ;;  %1586 = vmatpush.msra.mxu2 %v1509_v53 }
 0x2eb   : > { %v1499_v56 = vadd.f32 %v1498_v55, %v2579_v36  ;;  %1566 = vmatpush.msrb.mxu1 %v1508_v54  ;;  %1942 = vmatmul.msk.f32.vlgmr.msra.gmra.mxu2 %vm776_vm0, %v2551_v23 }
 0x2ec   : > { %1941 = vmatmul.msk.f32.vlgmr.msrb.gmra.mxu1 %vm776_vm0, %v2551_v23 }
 0x2ed   : > { %v1505_v57 = vmax.f32 %v1499_v56, 0.0 }
 0x2ef   : > { %v1510_v58 = vadd.f32 %v1505_v57, %v2557_v30 }
 0x2f1   : > { %1606 = vmatpush.msrb.mxu3 %v1510_v58 }
 0x2f2   : > { %1943 = vmatmul.msk.f32.vlgmr.msrb.gmra.mxu3 %vm776_vm0, %v2551_v23 }
 0x361   : > { %v1548_v59 = vpop.f32.mrf.mxu0 }
 0x362   : > { %v1549_v60 = vadd.f32 %v1548_v59, %v2579_v36 }
 0x364   : > { %v1612_v61 = vmax.f32 %v1549_v60, 0.0 }
 0x366   : > { %v1617_v62 = vadd.f32 %v1612_v61, %v2548_v22 }
 0x368   : > { %1656 = vmatpush.msra.mxu1 %v1617_v62 }
 0x369   : > { %1945 = vmatmul.msk.f32.vlgmr.msra.gmra.mxu1 %vm776_vm0, %v2551_v23  ;;  %v1568_v63 = vpop.f32.mrf.mxu1 }
 0x36a   : > { %v1569_v0 = vadd.f32 %v1568_v63, %v2579_v36 }
 0x36c   : > { %v1613_v1 = vmax.f32 %v1569_v0, 0.0 }
 0x36d   : > { %v1528_v2 = vpop.f32.mrf.mxu3 }
 0x36e   : > { %v1618_v3 = vadd.f32 %v1613_v1, %v1390_v31  ;;  %v1529_v4 = vadd.f32 %v1528_v2, %v2579_v36  ;;  %v1588_v5 = vpop.f32.mrf.mxu2 }
 0x36f   : > { %v1589_v6 = vadd.f32 %v1588_v5, %v2579_v36 }
 0x370   : > { %v1611_v7 = vmax.f32 %v1529_v4, 0.0  ;;  %1676 = vmatpush.msrb.mxu2 %v1618_v3 }
 0x371   : > { %v1614_v8 = vmax.f32 %v1589_v6, 0.0  ;;  %1946 = vmatmul.msk.f32.vlgmr.msrb.gmra.mxu2 %vm776_vm0, %v2551_v23 }
 0x372   : > { %v1616_v9 = vadd.f32 %v1611_v7, %v2546_v21 }
 0x373   : > { %v1619_v10 = vadd.f32 %v1614_v8, %v2559_v32 }
 0x374   : > { %1636 = vmatpush.msra.mxu0 %v1616_v9 }
 0x375   : > { %v1608_v11 = vpop.f32.mrf.mxu3  ;;  %1944 = vmatmul.msk.f32.vlgmr.msra.gmra.mxu0 %vm776_vm0, %v2551_v23  ;;  %1696 = vmatpush.msra.mxu3 %v1619_v10 }
 0x376   : > { %v1609_v12 = vadd.f32 %v1608_v11, %v2579_v36  ;;  %1947 = vmatmul.msk.f32.vlgmr.msra.gmra.mxu3 %vm776_vm0, %v2551_v23 }
 0x378   : > { %v1615_v13 = vmax.f32 %v1609_v12, 0.0 }
 0x37a   : > { %v1620_v14 = vadd.f32 %v1615_v13, %v2557_v30 }
 0x37c   : > { %1716 = vmatpush.msrb.mxu0 %v1620_v14 }
 0x37d   : > { %1948 = vmatmul.msk.f32.vlgmr.msrb.gmra.mxu0 %vm776_vm0, %v2551_v23 }
 0x3e6   : > { %v1658_v15 = vpop.f32.mrf.mxu1 }
 0x3e7   : > { %v1659_v16 = vadd.f32 %v1658_v15, %v2579_v36 }
 0x3e9   : > { %v1722_v19 = vmax.f32 %v1659_v16, 0.0 }
 0x3eb   : > { %v1727_v20 = vadd.f32 %v1722_v19, %v1326_v18 }
 0x3ed   : > { %1732 = vst [vmem:[%s2626_s18 + $0x8] sm:$0xff] %v1727_v20 }
 0x3f2   : > { %v1638_v21 = vpop.f32.mrf.mxu0 }
 0x3f3   : > { %v1639_v22 = vadd.f32 %v1638_v21, %v2579_v36 }
 0x3f4   : > { %v1678_v23 = vpop.f32.mrf.mxu2 }
 0x3f5   : > { %v1721_v25 = vmax.f32 %v1639_v22, 0.0  ;;  %v1679_v26 = vadd.f32 %v1678_v23, %v2579_v36 }
 0x3f7   : > { %v1726_v28 = vadd.f32 %v1721_v25, %v1306_v24  ;;  %v1723_v29 = vmax.f32 %v1679_v26, 0.0 }
 0x3f9   : > { %1731 = vst [vmem:[%s2626_s18] sm:$0xff] %v1726_v28  ;;  %v1728_v30 = vadd.f32 %v1723_v29, %v1346_v27  ;;  %v1698_v31 = vpop.f32.mrf.mxu3 }
 0x3fa   : > { %v1699_v32 = vadd.f32 %v1698_v31, %v2579_v36  ;;  %v1718_v33 = vpop.f32.mrf.mxu0 }
 0x3fb   : > { %1733 = vst [vmem:[%s2626_s18 + $0x10] sm:$0xff] %v1728_v30  ;;  %v1719_v35 = vadd.f32 %v1718_v33, %v2579_v36 }
 0x3fc   : > { %v1724_v38 = vmax.f32 %v1699_v32, 0.0 }
 0x3fd   : > { %v1725_v41 = vmax.f32 %v1719_v35, 0.0 }
 0x3fe   : > { %v1729_v42 = vadd.f32 %v1724_v38, %v1366_v34 }
 0x3ff   : > { %v1730_v43 = vadd.f32 %v1725_v41, %v1386_v40 }
 0x400   : > { %1734 = vst [vmem:[%s2626_s18 + $0x18] sm:$0xff] %v1729_v42 }
 0x401   : > { %1735 = vst [vmem:[%s2626_s18 + $0x20] sm:$0xff] %v1730_v43 }
 0x402   : > { %2203 = shalt.err (!%p2200_p0)
}
 0x403   : > { %1971 = dma.vmem_to_hbm [thread:$0]  (%p2445_p4), %s1753_s21, 640, %s1755_s26, %s1737_s25  }
 0x404 PF: > { %s2727_s16 = sld [smem:[#allocation15_spill]]  ;;  %p1988_p2 = pnand %p1904_p6, %p2453_p7 }
 0x406   : > { %p1989_p5 = pneg %p1988_p2 }
 0x40a   : > { %s1766_s18 = sand.u32 1, %s2727_s16  }
 0x40b   : > { %s1767_s22 = scalar_lea.sflag [#allocation4], %s1766_s18 }
 0x40c   : > { %2241 = dma.done.wait (%p1989_p5), %s1767_s22, 640  }
 0x40d   : > { %2243 = vsyncadd (%p1989_p5), %s1767_s22, 4294966656  ;;  %s33_s23 = sadd.s32 1, %s2266_s23   ;;  %s2728_s29 = sld [smem:[#allocation18_spill]] }
 0x40e   : > { %p30_p9 = scmp.ge.s32.totalorder %s33_s23, 4   ;;  %s2729_s21 = sld [smem:[#allocation16_spill]] }
 0x40f   : > { %s2730_s22 = sld [smem:[#allocation17_spill]]  ;;  %s2731_s18 = smov %s2250_s19 }
 0x410   : > { %s2732_s19 = smov %s2254_s20  ;;  %32 = sbr.rel (!%p30_p9) target bundleno = 16 (0x10), region = 143 }
 0x413   : > { %s2733_s20 = smov %s2728_s29 }
 0x415   :  { %1773 = vsyncpa [#allocation3], 1 }
 0x416   :  { %1775 = vsyncpa [#allocation3 + $0x1], 1 }
 0x417   :  { %1776 = vsyncpa [#allocation6], 1 }
 0x418   :  { %1777 = vsyncpa [#allocation9], 1 }
 0x419   :  { %1778 = vsyncpa [#allocation4], 1 }
 0x41a   :  { %1780 = vsyncpa [#allocation4 + $0x1], 1 }

</bundles_post_ra>
